<compile_context>
chip_gen: v7x
topology: tpu7x:2x2x1
jax: 0.10.0
libtpu: 0.0.40
codegen_flags: <defaults>
</compile_context>

<pallas_src>
import functools

import jax
import jax.numpy as jnp
from jax.experimental import pallas as pl
from jax.experimental.pallas import tpu as pltpu


def get_same_pad(k, s, d):
    assert not (s > 1 and d > 1)
    if s > 1:
        return (k - s + 1) // 2
    return (k - 1) * d // 2


# ----------------------------- fused Pallas kernel -----------------------------

def _resblock_kernel(x_ref, w1_ref, b1_ref, w2_ref, sw_ref, pv_ref,
                     o_ref, orth_ref,
                     xpad_ref, hpad_ref, *,
                     dil, p1, p2, stride, c_in, d_bot):
    """One batch element of the full ResBlock forward.

    x_ref   : (1, L, C_in)        channels-last block input
    w1_ref  : (2*C_in, d_bot)     f1 conv taps stacked row-wise (tap0 rows, tap1 rows)
    b1_ref  : (1, d_bot)
    w2_ref  : (2*d_bot, C_out)    f2 conv taps stacked row-wise
    sw_ref  : (C_in, C_out)       1x1 scale-conv weight
    pv_ref  : (4, C_out)          rows = [bn_scale, bn_shift, scale_bias, f2_bias]
    o_ref   : (1, L_pool, C_out)  pooled output
    orth_ref: (1, 1, 1)           semi_orth_obj (same value written per batch step)
    xpad_ref: VMEM (L + 2*p1, C_in)   scratch: zero-padded block input
    hpad_ref: VMEM (L1 + 2*p2, d_bot) scratch: zero-padded f1 output
    """
    L = x_ref.shape[1]
    L1 = L + 2 * p1 - dil          # f1 output length
    L2 = L1 + 2 * p2 - dil         # f2 output length (== L)
    L_pool = L2 // stride

    x = x_ref[0]                                            # (L, C_in)
    pv = pv_ref[...]                                        # (4, C_out)

    # ---- f1: Conv1d(C_in -> d_bot, k=2, dilation=dil, padding=p1) ----
    xpad_ref[...] = jnp.zeros_like(xpad_ref)
    xpad_ref[pl.ds(p1, L), :] = x
    w1a = w1_ref[0:c_in, :]                                 # tap 0   (C_in, d_bot)
    w1b = w1_ref[c_in:2 * c_in, :]                          # tap 1
    h1 = (jnp.dot(xpad_ref[pl.ds(0, L1), :], w1a, preferred_element_type=jnp.float32)
          + jnp.dot(xpad_ref[pl.ds(dil, L1), :], w1b, preferred_element_type=jnp.float32)
          + b1_ref[...])                                    # (L1, d_bot)

    # ---- f2: Conv1d(d_bot -> C_out, k=2, dilation=dil, padding=p2) ----
    hpad_ref[...] = jnp.zeros_like(hpad_ref)
    hpad_ref[pl.ds(p2, L1), :] = h1
    w2a = w2_ref[0:d_bot, :]                                # tap 0   (d_bot, C_out)
    w2b = w2_ref[d_bot:2 * d_bot, :]                        # tap 1
    h2 = (jnp.dot(hpad_ref[pl.ds(0, L2), :], w2a, preferred_element_type=jnp.float32)
          + jnp.dot(hpad_ref[pl.ds(dil, L2), :], w2b, preferred_element_type=jnp.float32)
          + pv[3:4, :])                                     # (L2, C_out)

    # ---- post: BatchNorm (eval, folded scale/shift) + ReLU; Dropout = identity ----
    hn = jnp.maximum(h2 * pv[0:1, :] + pv[1:2, :], 0.0)

    # ---- scale: Conv1d(C_in -> C_out, k=1) + residual add ----
    scaled = jnp.dot(x, sw_ref[...], preferred_element_type=jnp.float32) + pv[2:3, :]
    y = hn + scaled                                         # (L2, C_out), L2 == L

    # ---- AvgPool1d(stride, padding=0): tiny in-kernel pooling matrix on the MXU ----
    if stride == 1:
        o_ref[0] = y.astype(o_ref.dtype)
    else:
        rows = jax.lax.broadcasted_iota(jnp.int32, (L_pool, L2), 0)
        cols = jax.lax.broadcasted_iota(jnp.int32, (L_pool, L2), 1)
        pm = jnp.where((cols >= rows * stride) & (cols < rows * stride + stride),
                       1.0 / stride, 0.0).astype(jnp.float32)
        o_ref[0] = jnp.dot(pm, y, preferred_element_type=jnp.float32).astype(o_ref.dtype)

    # ---- semi_orth_obj of f1 weights: || m m^T - I ||_F^2 ----
    m = w1_ref[...]                                         # (2*C_in, d_bot)
    p = jax.lax.dot_general(m, m, (((1,), (1,)), ((), ())),
                            preferred_element_type=jnp.float32)   # (2*C_in, 2*C_in)
    ri = jax.lax.broadcasted_iota(jnp.int32, p.shape, 0)
    ci = jax.lax.broadcasted_iota(jnp.int32, p.shape, 1)
    q = p - jnp.where(ri == ci, 1.0, 0.0).astype(p.dtype)
    s = jnp.sum(q * q, axis=1, keepdims=True)               # (2*C_in, 1)
    orth_ref[0] = jnp.sum(s, axis=0, keepdims=True)         # (1, 1)


# ----------------------------- wrapper -----------------------------

def res_block_forward(x, params, *, dilation, stride):
    """x: (B, in_c, L) like PyTorch NCL. Returns (pooled (B, out_c, L_pool), orth_loss)."""
    B, C_in, L = x.shape
    d_bot = params["f1_w"].shape[1]                         # f1_w: (2*C_in, d_bot)
    C_out = params["f2_w"].shape[1]                         # f2_w: (2*d_bot, C_out)

    pad = get_same_pad(2, 1, dilation)
    p1 = pad if dilation % 2 == 0 else pad + 1              # PyTorch pads symmetrically
    p2 = pad
    L1 = L + 2 * p1 - dilation
    L2 = L1 + 2 * p2 - dilation
    assert L2 == L, "residual add requires conv output length == input length"
    assert get_same_pad(stride, stride, 1) == 0
    L_pool = L2 // stride

    # channels-last so the channel contraction of every conv lands on MXU lanes
    x_nlc = jnp.transpose(x, (0, 2, 1)).astype(jnp.float32)

    # Fold BatchNorm(eval) into scale/shift; pack all per-C_out vectors into one slab.
    eps = 1e-5
    bn_scale = params["bn_gamma"] * jax.lax.rsqrt(params["bn_var"] + eps)
    bn_shift = params["bn_beta"] - params["bn_mean"] * bn_scale
    pvec = jnp.stack([bn_scale, bn_shift, params["scale_b"], params["f2_b"]],
                     axis=0).astype(jnp.float32)
    b1 = params["f1_b"].reshape(1, d_bot).astype(jnp.float32)

    kernel = functools.partial(_resblock_kernel, dil=dilation, p1=p1, p2=p2,
                               stride=stride, c_in=C_in, d_bot=d_bot)

    out, orth = pl.pallas_call(
        kernel,
        out_shape=(jax.ShapeDtypeStruct((B, L_pool, C_out), jnp.float32),
                   jax.ShapeDtypeStruct((B, 1, 1), jnp.float32)),
        grid_spec=pltpu.PrefetchScalarGridSpec(
            num_scalar_prefetch=0,
            grid=(B,),
            in_specs=[
                pl.BlockSpec((1, L, C_in), lambda i: (i, 0, 0)),
                pl.BlockSpec((2 * C_in, d_bot), lambda i: (0, 0)),
                pl.BlockSpec((1, d_bot), lambda i: (0, 0)),
                pl.BlockSpec((2 * d_bot, C_out), lambda i: (0, 0)),
                pl.BlockSpec((C_in, C_out), lambda i: (0, 0)),
                pl.BlockSpec((4, C_out), lambda i: (0, 0)),
            ],
            out_specs=[
                pl.BlockSpec((1, L_pool, C_out), lambda i: (i, 0, 0)),
                pl.BlockSpec((1, 1, 1), lambda i: (i, 0, 0)),
            ],
            scratch_shapes=[
                pltpu.VMEM((L + 2 * p1, C_in), jnp.float32),
                pltpu.VMEM((L1 + 2 * p2, d_bot), jnp.float32),
            ],
        ),
        compiler_params=pltpu.CompilerParams(dimension_semantics=("parallel",)),
    )(x_nlc, params["f1_w"], b1, params["f2_w"], params["scale_w"], pvec)

    pooled = jnp.transpose(out, (0, 2, 1))                  # back to NCL (B, C_out, L_pool)
    return pooled, orth[0, 0, 0]


# ----------------------------- params -----------------------------

def init_params(key, in_c, d_bottleneck, out_c):
    keys = iter(jax.random.split(key, 16))

    def nrm(shape, scale=0.05):
        return (scale * jax.random.normal(next(keys), shape)).astype(jnp.float32)

    return dict(
        # Conv taps stacked row-wise: rows [0:in) = tap0, rows [in:2*in) = tap1,
        # entry [k*in + ci, o] == torch weight[o, ci, k].
        f1_w=nrm((2 * in_c, d_bottleneck)),
        f1_b=nrm((d_bottleneck,)),
        f2_w=nrm((2 * d_bottleneck, out_c)),
        f2_b=nrm((out_c,)),
        scale_w=nrm((in_c, out_c)),                         # 1x1 conv as (C_in, C_out)
        scale_b=nrm((out_c,)),
        bn_gamma=1.0 + nrm((out_c,), 0.1),
        bn_beta=nrm((out_c,), 0.1),
        bn_mean=nrm((out_c,), 0.1),
        bn_var=1.0 + jnp.abs(nrm((out_c,), 0.1)),
        # TODO(synk): BatchNorm is eval-mode (running stats); training-mode batch
        # statistics are not implemented. Dropout is identity (inference).
    )


if __name__ == "__main__":
    B, in_c, L = 2, 4, 24
    d_bottleneck, out_c = 128, 32
    kernel_size, stride, dilation = 2, 3, 2   # ResBlock(in_c, d_bot, out_c, k, stride, dil, p)

    key = jax.random.PRNGKey(0)
    kx, kp = jax.random.split(key)
    x = jax.random.normal(kx, (B, in_c, L), dtype=jnp.float32)
    params = init_params(kp, in_c, d_bottleneck, out_c)

    fwd = jax.jit(functools.partial(res_block_forward, dilation=dilation, stride=stride))
    pooled, orth = fwd(x, params)
    jax.block_until_ready((pooled, orth))

    assert pooled.shape == (B, out_c, L // stride), pooled.shape
    assert orth.shape == (), orth.shape
    print("KERNEL_OK")
</pallas_src>

<mosaic_0001>
module attributes {stable_mosaic.version = 11 : i64} {
  func.func @_resblock_kernel(%arg0: i32, %arg1: memref<1x24x4xf32, #tpu.memory_space<vmem>>, %arg2: memref<8x128xf32, #tpu.memory_space<vmem>>, %arg3: memref<1x128xf32, #tpu.memory_space<vmem>>, %arg4: memref<256x32xf32, #tpu.memory_space<vmem>>, %arg5: memref<4x32xf32, #tpu.memory_space<vmem>>, %arg6: memref<4x32xf32, #tpu.memory_space<vmem>>, %arg7: memref<1x8x32xf32, #tpu.memory_space<vmem>>, %arg8: memref<1x1x1xf32, #tpu.memory_space<vmem>>, %arg9: memref<26x4xf32, #tpu.memory_space<vmem>>, %arg10: memref<26x128xf32, #tpu.memory_space<vmem>>) attributes {dimension_semantics = [#tpu.dimension_semantics<parallel>], iteration_bounds = array<i64: 2>, scalar_prefetch = 0 : i64, scratch_operands = 2 : i64, tpu.core_type = #tpu.core_type<tc>, window_params = [{transform_indices = @transform_0, window_bounds = array<i64: 1, 24, 4>}, {pipeline_mode = #tpu.pipeline_mode<synchronous>, transform_indices = @transform_1, window_bounds = array<i64: 8, 128>}, {pipeline_mode = #tpu.pipeline_mode<synchronous>, transform_indices = @transform_2, window_bounds = array<i64: 1, 128>}, {pipeline_mode = #tpu.pipeline_mode<synchronous>, transform_indices = @transform_3, window_bounds = array<i64: 256, 32>}, {pipeline_mode = #tpu.pipeline_mode<synchronous>, transform_indices = @transform_4, window_bounds = array<i64: 4, 32>}, {pipeline_mode = #tpu.pipeline_mode<synchronous>, transform_indices = @transform_5, window_bounds = array<i64: 4, 32>}, {transform_indices = @transform_6, window_bounds = array<i64: 1, 8, 32>}, {transform_indices = @transform_7, window_bounds = array<i64: 1, 1, 1>}]} {
    %c0 = arith.constant 0 : index
    %c0_0 = arith.constant 0 : index
    %c0_1 = arith.constant 0 : index
    %0 = vector.load %arg1[%c0, %c0_0, %c0_1] : memref<1x24x4xf32, #tpu.memory_space<vmem>>, vector<1x24x4xf32>
    %1 = vector.shape_cast %0 : vector<1x24x4xf32> to vector<24x4xf32>
    %c0_2 = arith.constant 0 : index
    %c0_3 = arith.constant 0 : index
    %2 = vector.load %arg6[%c0_2, %c0_3] : memref<4x32xf32, #tpu.memory_space<vmem>>, vector<4x32xf32>
    %cst = arith.constant 0.000000e+00 : f32
    %3 = vector.broadcast %cst : f32 to vector<26x4xf32>
    %c0_4 = arith.constant 0 : index
    %c0_5 = arith.constant 0 : index
    %4 = vector.load %arg9[%c0_4, %c0_5] : memref<26x4xf32, #tpu.memory_space<vmem>>, vector<26x4xf32>
    tpu.vector_store %arg9[%c0_4, %c0_5], %3 {strides = array<i32>} : memref<26x4xf32, #tpu.memory_space<vmem>>, vector<26x4xf32>,
    %c1 = arith.constant 1 : index
    %c0_6 = arith.constant 0 : index
    %5 = vector.load %arg9[%c1, %c0_6] : memref<26x4xf32, #tpu.memory_space<vmem>>, vector<24x4xf32>
    tpu.vector_store %arg9[%c1, %c0_6], %1 {strides = array<i32>} : memref<26x4xf32, #tpu.memory_space<vmem>>, vector<24x4xf32>,
    %c0_7 = arith.constant 0 : index
    %c0_8 = arith.constant 0 : index
    %6 = vector.load %arg2[%c0_7, %c0_8] : memref<8x128xf32, #tpu.memory_space<vmem>>, vector<4x128xf32>
    %c4 = arith.constant 4 : index
    %c0_9 = arith.constant 0 : index
    %7 = vector.load %arg2[%c4, %c0_9] : memref<8x128xf32, #tpu.memory_space<vmem>>, vector<4x128xf32>
    %c0_10 = arith.constant 0 : index
    %c0_11 = arith.constant 0 : index
    %8 = vector.load %arg9[%c0_10, %c0_11] : memref<26x4xf32, #tpu.memory_space<vmem>>, vector<24x4xf32>
    %cst_12 = arith.constant dense<0.000000e+00> : vector<24x128xf32>
    %9 = tpu.matmul %8, %6, %cst_12 {dimension_numbers = #tpu.dot_dimension_numbers<[1], [0], [0], [1], [0, 0, 1, 1], [], []>} : vector<24x4xf32>, vector<4x128xf32>, vector<24x128xf32> -> vector<24x128xf32>
    %c2 = arith.constant 2 : index
    %c0_13 = arith.constant 0 : index
    %10 = vector.load %arg9[%c2, %c0_13] : memref<26x4xf32, #tpu.memory_space<vmem>>, vector<24x4xf32>
    %cst_14 = arith.constant dense<0.000000e+00> : vector<24x128xf32>
    %11 = tpu.matmul %10, %7, %cst_14 {dimension_numbers = #tpu.dot_dimension_numbers<[1], [0], [0], [1], [0, 0, 1, 1], [], []>} : vector<24x4xf32>, vector<4x128xf32>, vector<24x128xf32> -> vector<24x128xf32>
    %12 = arith.addf %9, %11 : vector<24x128xf32>
    %c0_15 = arith.constant 0 : index
    %c0_16 = arith.constant 0 : index
    %13 = vector.load %arg3[%c0_15, %c0_16] : memref<1x128xf32, #tpu.memory_space<vmem>>, vector<1x128xf32>
    %14 = vector.broadcast %13 : vector<1x128xf32> to vector<24x128xf32>
    %15 = arith.addf %12, %14 : vector<24x128xf32>
    %cst_17 = arith.constant 0.000000e+00 : f32
    %16 = vector.broadcast %cst_17 : f32 to vector<26x128xf32>
    %c0_18 = arith.constant 0 : index
    %c0_19 = arith.constant 0 : index
    %17 = vector.load %arg10[%c0_18, %c0_19] : memref<26x128xf32, #tpu.memory_space<vmem>>, vector<26x128xf32>
    tpu.vector_store %arg10[%c0_18, %c0_19], %16 {strides = array<i32>} : memref<26x128xf32, #tpu.memory_space<vmem>>, vector<26x128xf32>,
    %c1_20 = arith.constant 1 : index
    %c0_21 = arith.constant 0 : index
    %18 = vector.load %arg10[%c1_20, %c0_21] : memref<26x128xf32, #tpu.memory_space<vmem>>, vector<24x128xf32>
    tpu.vector_store %arg10[%c1_20, %c0_21], %15 {strides = array<i32>} : memref<26x128xf32, #tpu.memory_space<vmem>>, vector<24x128xf32>,
    %c0_22 = arith.constant 0 : index
    %c0_23 = arith.constant 0 : index
    %19 = vector.load %arg4[%c0_22, %c0_23] : memref<256x32xf32, #tpu.memory_space<vmem>>, vector<128x32xf32>
    %c128 = arith.constant 128 : index
    %c0_24 = arith.constant 0 : index
    %20 = vector.load %arg4[%c128, %c0_24] : memref<256x32xf32, #tpu.memory_space<vmem>>, vector<128x32xf32>
    %c0_25 = arith.constant 0 : index
    %c0_26 = arith.constant 0 : index
    %21 = vector.load %arg10[%c0_25, %c0_26] : memref<26x128xf32, #tpu.memory_space<vmem>>, vector<24x128xf32>
    %cst_27 = arith.constant dense<0.000000e+00> : vector<24x32xf32>
    %22 = tpu.matmul %21, %19, %cst_27 {dimension_numbers = #tpu.dot_dimension_numbers<[1], [0], [0], [1], [0, 0, 1, 1], [], []>} : vector<24x128xf32>, vector<128x32xf32>, vector<24x32xf32> -> vector<24x32xf32>
    %c2_28 = arith.constant 2 : index
    %c0_29 = arith.constant 0 : index
    %23 = vector.load %arg10[%c2_28, %c0_29] : memref<26x128xf32, #tpu.memory_space<vmem>>, vector<24x128xf32>
    %cst_30 = arith.constant dense<0.000000e+00> : vector<24x32xf32>
    %24 = tpu.matmul %23, %20, %cst_30 {dimension_numbers = #tpu.dot_dimension_numbers<[1], [0], [0], [1], [0, 0, 1, 1], [], []>} : vector<24x128xf32>, vector<128x32xf32>, vector<24x32xf32> -> vector<24x32xf32>
    %25 = arith.addf %22, %24 : vector<24x32xf32>
    %26 = vector.extract_strided_slice %2 {offsets = [3, 0], sizes = [1, 32], strides = [1, 1]} : vector<4x32xf32> to vector<1x32xf32>
    %27 = vector.broadcast %26 : vector<1x32xf32> to vector<24x32xf32>
    %28 = arith.addf %25, %27 : vector<24x32xf32>
    %29 = vector.extract_strided_slice %2 {offsets = [0, 0], sizes = [1, 32], strides = [1, 1]} : vector<4x32xf32> to vector<1x32xf32>
    %30 = vector.broadcast %29 : vector<1x32xf32> to vector<24x32xf32>
    %31 = arith.mulf %28, %30 : vector<24x32xf32>
    %32 = vector.extract_strided_slice %2 {offsets = [1, 0], sizes = [1, 32], strides = [1, 1]} : vector<4x32xf32> to vector<1x32xf32>
    %33 = vector.broadcast %32 : vector<1x32xf32> to vector<24x32xf32>
    %34 = arith.addf %31, %33 : vector<24x32xf32>
    %cst_31 = arith.constant 0.000000e+00 : f32
    %35 = vector.broadcast %cst_31 : f32 to vector<24x32xf32>
    %36 = arith.maximumf %34, %35 : vector<24x32xf32>
    %c0_32 = arith.constant 0 : index
    %c0_33 = arith.constant 0 : index
    %37 = vector.load %arg5[%c0_32, %c0_33] : memref<4x32xf32, #tpu.memory_space<vmem>>, vector<4x32xf32>
    %cst_34 = arith.constant dense<0.000000e+00> : vector<24x32xf32>
    %38 = tpu.matmul %1, %37, %cst_34 {dimension_numbers = #tpu.dot_dimension_numbers<[1], [0], [0], [1], [0, 0, 1, 1], [], []>} : vector<24x4xf32>, vector<4x32xf32>, vector<24x32xf32> -> vector<24x32xf32>
    %39 = vector.extract_strided_slice %2 {offsets = [2, 0], sizes = [1, 32], strides = [1, 1]} : vector<4x32xf32> to vector<1x32xf32>
    %40 = vector.broadcast %39 : vector<1x32xf32> to vector<24x32xf32>
    %41 = arith.addf %38, %40 : vector<24x32xf32>
    %42 = arith.addf %36, %41 : vector<24x32xf32>
    %43 = tpu.iota {dimensions = array<i32: 0>} : vector<8x24xi32>
    %44 = tpu.iota {dimensions = array<i32: 1>} : vector<8x24xi32>
    %c3_i32 = arith.constant 3 : i32
    %45 = vector.broadcast %c3_i32 : i32 to vector<8x24xi32>
    %46 = arith.muli %43, %45 : vector<8x24xi32>
    %47 = arith.cmpi sge, %44, %46 : vector<8x24xi32>
    %c3_i32_35 = arith.constant 3 : i32
    %48 = vector.broadcast %c3_i32_35 : i32 to vector<8x24xi32>
    %49 = arith.muli %43, %48 : vector<8x24xi32>
    %c3_i32_36 = arith.constant 3 : i32
    %50 = vector.broadcast %c3_i32_36 : i32 to vector<8x24xi32>
    %51 = arith.addi %49, %50 : vector<8x24xi32>
    %52 = arith.cmpi slt, %44, %51 : vector<8x24xi32>
    %53 = arith.andi %47, %52 : vector<8x24xi1>
    %cst_37 = arith.constant 0.333333343 : f32
    %cst_38 = arith.constant 0.000000e+00 : f32
    %54 = vector.broadcast %cst_37 : f32 to vector<8x24xf32>
    %55 = vector.broadcast %cst_38 : f32 to vector<8x24xf32>
    %56 = arith.select %53, %54, %55 : vector<8x24xi1>, vector<8x24xf32>
    %cst_39 = arith.constant dense<0.000000e+00> : vector<8x32xf32>
    %57 = tpu.matmul %56, %42, %cst_39 {dimension_numbers = #tpu.dot_dimension_numbers<[1], [0], [0], [1], [0, 0, 1, 1], [], []>} : vector<8x24xf32>, vector<24x32xf32>, vector<8x32xf32> -> vector<8x32xf32>
    %c0_40 = arith.constant 0 : index
    %c0_41 = arith.constant 0 : index
    %c0_42 = arith.constant 0 : index
    %58 = vector.load %arg7[%c0_40, %c0_41, %c0_42] : memref<1x8x32xf32, #tpu.memory_space<vmem>>, vector<1x8x32xf32>
    %59 = vector.shape_cast %58 : vector<1x8x32xf32> to vector<8x32xf32>
    %60 = vector.shape_cast %57 : vector<8x32xf32> to vector<1x8x32xf32>
    tpu.vector_store %arg7[%c0_40, %c0_41, %c0_42], %60 {strides = array<i32>} : memref<1x8x32xf32, #tpu.memory_space<vmem>>, vector<1x8x32xf32>,
    %c0_43 = arith.constant 0 : index
    %c0_44 = arith.constant 0 : index
    %61 = vector.load %arg2[%c0_43, %c0_44] : memref<8x128xf32, #tpu.memory_space<vmem>>, vector<8x128xf32>
    %cst_45 = arith.constant dense<0.000000e+00> : vector<8x8xf32>
    %62 = tpu.matmul %61, %61, %cst_45 {dimension_numbers = #tpu.dot_dimension_numbers<[1], [1], [0], [0], [0, 0, 1, 0], [], []>} : vector<8x128xf32>, vector<8x128xf32>, vector<8x8xf32> -> vector<8x8xf32>
    %63 = tpu.iota {dimensions = array<i32: 0>} : vector<8x8xi32>
    %64 = tpu.iota {dimensions = array<i32: 1>} : vector<8x8xi32>
    %65 = arith.cmpi eq, %63, %64 : vector<8x8xi32>
    %cst_46 = arith.constant 1.000000e+00 : f32
    %cst_47 = arith.constant 0.000000e+00 : f32
    %66 = vector.broadcast %cst_46 : f32 to vector<8x8xf32>
    %67 = vector.broadcast %cst_47 : f32 to vector<8x8xf32>
    %68 = arith.select %65, %66, %67 : vector<8x8xi1>, vector<8x8xf32>
    %69 = arith.subf %62, %68 : vector<8x8xf32>
    %70 = arith.mulf %69, %69 : vector<8x8xf32>
    %cst_48 = arith.constant dense<0.000000e+00> : vector<8xf32>
    %71 = vector.multi_reduction <add>, %70, %cst_48 [1] : vector<8x8xf32> to vector<8xf32>
    %72 = vector.shape_cast %71 : vector<8xf32> to vector<8x1xf32>
    %cst_49 = arith.constant dense<0.000000e+00> : vector<1xf32>
    %73 = vector.multi_reduction <add>, %72, %cst_49 [0] : vector<8x1xf32> to vector<1xf32>
    %74 = vector.shape_cast %73 : vector<1xf32> to vector<1x1xf32>
    %c0_50 = arith.constant 0 : index
    %c0_51 = arith.constant 0 : index
    %c0_52 = arith.constant 0 : index
    %75 = vector.load %arg8[%c0_50, %c0_51, %c0_52] : memref<1x1x1xf32, #tpu.memory_space<vmem>>, vector<1x1x1xf32>
    %76 = vector.shape_cast %75 : vector<1x1x1xf32> to vector<1x1xf32>
    %77 = vector.shape_cast %74 : vector<1x1xf32> to vector<1x1x1xf32>
    tpu.vector_store %arg8[%c0_50, %c0_51, %c0_52], %77 {strides = array<i32>} : memref<1x1x1xf32, #tpu.memory_space<vmem>>, vector<1x1x1xf32>,
    return
  }
  func.func @transform_0(%arg0: i32) -> (i32, i32, i32) {
    %c0_i32 = arith.constant 0 : i32
    %c0_i32_0 = arith.constant 0 : i32
    %c0_i32_1 = arith.constant 0 : i32
    return %arg0, %c0_i32, %c0_i32_0 : i32, i32, i32
  }
  func.func @transform_1(%arg0: i32) -> (i32, i32) {
    %c0_i32 = arith.constant 0 : i32
    %c0_i32_0 = arith.constant 0 : i32
    %c0_i32_1 = arith.constant 0 : i32
    return %c0_i32, %c0_i32_0 : i32, i32
  }
  func.func @transform_2(%arg0: i32) -> (i32, i32) {
    %c0_i32 = arith.constant 0 : i32
    %c0_i32_0 = arith.constant 0 : i32
    %c0_i32_1 = arith.constant 0 : i32
    return %c0_i32, %c0_i32_0 : i32, i32
  }
  func.func @transform_3(%arg0: i32) -> (i32, i32) {
    %c0_i32 = arith.constant 0 : i32
    %c0_i32_0 = arith.constant 0 : i32
    %c0_i32_1 = arith.constant 0 : i32
    return %c0_i32, %c0_i32_0 : i32, i32
  }
  func.func @transform_4(%arg0: i32) -> (i32, i32) {
    %c0_i32 = arith.constant 0 : i32
    %c0_i32_0 = arith.constant 0 : i32
    %c0_i32_1 = arith.constant 0 : i32
    return %c0_i32, %c0_i32_0 : i32, i32
  }
  func.func @transform_5(%arg0: i32) -> (i32, i32) {
    %c0_i32 = arith.constant 0 : i32
    %c0_i32_0 = arith.constant 0 : i32
    %c0_i32_1 = arith.constant 0 : i32
    return %c0_i32, %c0_i32_0 : i32, i32
  }
  func.func @transform_6(%arg0: i32) -> (i32, i32, i32) {
    %c0_i32 = arith.constant 0 : i32
    %c0_i32_0 = arith.constant 0 : i32
    %c0_i32_1 = arith.constant 0 : i32
    return %arg0, %c0_i32, %c0_i32_0 : i32, i32, i32
  }
  func.func @transform_7(%arg0: i32) -> (i32, i32, i32) {
    %c0_i32 = arith.constant 0 : i32
    %c0_i32_0 = arith.constant 0 : i32
    %c0_i32_1 = arith.constant 0 : i32
    return %arg0, %c0_i32, %c0_i32_0 : i32, i32, i32
  }
}

</mosaic_0001>

<bundles_post_ra>
// kernel: res_block_forward.1
= control target key start
LH: loop header
LB: loop body
LE: loop exit
PB: predicated region body
PF: predicated region fallthrough
CT: control target
= control target key end

     0   :  { %13 = vsyncpa [#allocation5], 0  ;;  %s1834_s0 = inlined_call_operand.vmem [shape: f32[2,24,4], index: 0, kind: input, shape index: {}]   ;;  %s1835_s1 = inlined_call_operand.vmem [shape: f32[8,128], index: 1, kind: input, shape index: {}]   ;;  %s1836_s2 = inlined_call_operand.vmem [shape: f32[1,128], index: 2, kind: input, shape index: {}]   ;;  %s1837_s3 = inlined_call_operand.vmem [shape: f32[256,32], index: 3, kind: input, shape index: {}]   ;;  %s1838_s4 = inlined_call_operand.vmem [shape: f32[4,32], index: 4, kind: input, shape index: {}]   ;;  %s1839_s5 = inlined_call_operand.vmem [shape: f32[4,32], index: 5, kind: input, shape index: {}]   ;;  %s1840_s6 = inlined_call_operand.hbm [shape: f32[2,8,32], index: 6, kind: output, shape index: {0}]   ;;  %s1841_s7 = inlined_call_operand.vmem [shape: f32[2,1,1], index: 7, kind: output, shape index: {1}]  }
   0x1   :  { %15 = vsyncpa [#allocation5 + $0x1], 0  ;;  %s1513_s24 = smov 0   ;;  %s1515_s25 = smov 0  }
   0x2   :  { %s1517_s26 = smov 0   ;;  %s1519_s27 = smov 0  }
   0x3 LB: > { %s1534_s28 = sadd.s32 4294967295, %s1467_s27   ;;  %s1102_s29 = sadd.s32 4294967294, %s1467_s27   ;;  %s1467_s27 = sphi %s1519_s27, %s1847_s27   ;;  %s1463_s26 = sphi %s1517_s26, %s1846_s26   ;;  %s1459_s25 = sphi %s1515_s25, %s1845_s25   ;;  %s1455_s24 = sphi %s1513_s24, %s1844_s24  }
   0x4   : > { %s1538_s30 = sadd.s32 1, %s1467_s27   ;;  %s159_s8 = sadd.s32 1, %s1463_s26 }
   0x5   : > { %s156_s9 = ssub.s32 %s1467_s27, %s1538_s30  ;;  %p169_p0 = scmp.ne.s32.totalorder %s1463_s26, %s1459_s25 }
   0x6   : > { %p157_p1 = scmp.eq.s32.totalorder %s156_s9, 0  ;;  %p170_p2 = scmp.eq.s32.totalorder %s1534_s28, 1 }
   0x7   : > { %p175_p3 = scmp.ne.s32.totalorder %s1459_s25, %s1455_s24  ;;  %p176_p4 = scmp.eq.s32.totalorder %s1102_s29, 1 }
   0x8   : > { %s1549_s10 = scalar_select %p157_p1, %s1463_s26, %s159_s8  }
   0x9   : > { %p1551_p5 = por %p170_p2, %p169_p0  ;;  %p1555_p6 = por %p176_p4, %p175_p3 }
   0xa   : > { %p1105_p7 = scmp.ge.s32.totalorder %s1467_s27, 1  ;;  %p243_p8 = scmp.lt.s32.totalorder %s1467_s27, 3 }
   0xc   : > { %p244_p9 = pnand %p1105_p7, %p243_p8 }
   0xd   : > { %v300_v0 = vld [vmem:[%s1835_s1 + $0x4] sm:$0xf] (!%p244_p9)  ;;  %vm316_vm0 = vcmask (!%p244_p9), 1043456   ;;  %p278_p10 = scmp.lt.s32.totalorder (!%p244_p9), %s1534_s28, 1  ;;  %v1469_v1 = vmov (!%p244_p9), 0.0   ;;  %vm290_vm1 = vcmask (!%p244_p9), 31744  }
   0xe   : > { %247 = sbr.rel (%p244_p9) target bundleno = 884 (0x374), region = 44  ;;  %1182 = vmatprep.subr.mxu0 (!%p244_p9), %v1469_v1  ;;  %502 = vst [vmem:[#allocation3] sm:$0xff] (!%p244_p9), %v1469_v1  ;;  %503 = vst [vmem:[#allocation3 + $0x8] sm:$0xff] (!%p244_p9), %v1469_v1  ;;  %1193 = vmatprep.subr.mxu1 (!%p244_p9), %v1469_v1  ;;  %v299_v2 = vld [vmem:[%s1835_s1] sm:$0xf] (!%p244_p9)  ;;  %vm294_vm2 = vcmask (!%p244_p9), 25600  }
   0xf   : > { %504 = vst [vmem:[#allocation3 + $0x10] sm:$0xff] (!%p244_p9), %v1469_v1  ;;  %505 = vst [vmem:[#allocation3 + $0x18] sm:$0x3] (!%p244_p9), %v1469_v1  ;;  %1183 = vmatpush3.msk.msra.mxu0 (!%p244_p9), %vm316_vm0, %v300_v0  ;;  %vm1470_vm3 = vmmov (!%p244_p9), 0   ;;  %1194 = vmatpush3.msk.msra.mxu1 (!%p244_p9), %vm316_vm0, %v299_v2  ;;  %v1471_v3 = vmov (!%p244_p9), 0.0|0.0   ;;  %v509_v7 = vld [vmem:[%s1837_s3] sm:$0xff] (!%p244_p9) }
  0x10   : > { %1184 = vmatprep.mubr.msk.f32.mxu0 (!%p244_p9), %vm1470_vm3, %v1469_v1  ;;  %291 = vst.msk [vmem:[#allocation2] sm:$0xff] (!%p244_p9), %vm290_vm1, %v1469_v1  ;;  %292 = vst.msk [vmem:[#allocation2 + $0x8] sm:$0xff] (!%p244_p9), %vm290_vm1, %v1469_v1  ;;  %1195 = vmatprep.mubr.msk.f32.mxu1 (!%p244_p9), %vm1470_vm3, %v1469_v1  ;;  %v510_v8 = vld [vmem:[%s1837_s3 + $0x8] sm:$0xff] (!%p244_p9)  ;;  %v525_v9 = vld [vmem:[%s1837_s3 + $0x80] sm:$0xff] (!%p244_p9)  ;;  %vm841_vm7 = vcmask (!%p244_p9), 195584   ;;  %s270_s15 = sand.u32 (!%p244_p9), 1, %s1459_s25  }
  0x11   : > { %293 = vst.msk [vmem:[#allocation2 + $0x10] sm:$0xff] (!%p244_p9), %vm290_vm1, %v1469_v1  ;;  %1335 = vmatprep.subr.bf16.mxu1 (!%p244_p9), %v1471_v3  ;;  %1311 = vmatprep.subr.bf16.mxu0 (!%p244_p9), %v1471_v3  ;;  %v526_v10 = vld [vmem:[%s1837_s3 + $0x88] sm:$0xff] (!%p244_p9)  ;;  %v1336_v11 = vpack.c.bf16 (!%p244_p9), %v510_v8, %v509_v7  ;;  %v511_v13 = vld [vmem:[%s1837_s3 + $0x10] sm:$0xff] (!%p244_p9)  ;;  %v512_v14 = vld [vmem:[%s1837_s3 + $0x18] sm:$0xff] (!%p244_p9)  ;;  %s1106_s16 = sshll.u32 (!%p244_p9), %s270_s15, 3  ;;  %vm915_vm8 = vcmask (!%p244_p9), 261120  }
  0x12   : > { %295 = vst.msk [vmem:[#allocation2 + $0x18] sm:$0x3] (!%p244_p9), %vm294_vm2, %v1469_v1  ;;  %v1312_v12 = vpack.c.bf16 (!%p244_p9), %v526_v10, %v525_v9  ;;  %v527_v15 = vld [vmem:[%s1837_s3 + $0x90] sm:$0xff] (!%p244_p9)  ;;  %v528_v18 = vld [vmem:[%s1837_s3 + $0x98] sm:$0xff] (!%p244_p9)  ;;  %v1339_v21 = vpack.c.bf16 (!%p244_p9), %v512_v14, %v511_v13  ;;  %v513_v23 = vld [vmem:[%s1837_s3 + $0x20] sm:$0xff] (!%p244_p9)  ;;  %vm992_vm10 = vcmask (!%p244_p9), 64512  }
  0x13   : > { %v1315_v22 = vpack.c.bf16 (!%p244_p9), %v528_v18, %v527_v15  ;;  %v514_v24 = vld [vmem:[%s1837_s3 + $0x28] sm:$0xff] (!%p244_p9)  ;;  %v529_v25 = vld [vmem:[%s1837_s3 + $0xa0] sm:$0xff] (!%p244_p9)  ;;  %v515_v31 = vld [vmem:[%s1837_s3 + $0x30] sm:$0xff] (!%p244_p9)  ;;  %s1123_s19 = sshll.u32 (!%p244_p9), %s1534_s28, 7  ;;  %s1005_s29 = scalar_lea.sflag (!%p244_p9), [#allocation5], %s270_s15 }
  0x14   : > { %v530_v26 = vld [vmem:[%s1837_s3 + $0xa8] sm:$0xff] (!%p244_p9)  ;;  %v1342_v29 = vpack.c.bf16 (!%p244_p9), %v514_v24, %v513_v23  ;;  %v516_v32 = vld [vmem:[%s1837_s3 + $0x38] sm:$0xff] (!%p244_p9)  ;;  %v531_v33 = vld [vmem:[%s1837_s3 + $0xb0] sm:$0xff] (!%p244_p9)  ;;  %s1794_s23 = scalar_lea.hbm (!%p244_p9), %s1840_s6, %s1123_s19  ;;  %s1472_s9 = smov (!%p244_p9), [#allocation4]  }
  0x15   : > { %s1580_s17 = scalar_select %p278_p10, %s1534_s28, 1  ;;  %v1318_v30 = vpack.c.bf16 %v530_v26, %v529_v25  ;;  %v532_v34 = vld [vmem:[%s1837_s3 + $0xb8] sm:$0xff]  ;;  %v1345_v35 = vpack.c.bf16 %v516_v32, %v515_v31  ;;  %v517_v37 = vld [vmem:[%s1837_s3 + $0x40] sm:$0xff]  ;;  %v518_v38 = vld [vmem:[%s1837_s3 + $0x48] sm:$0xff] }
  0x16   : > { %v1321_v36 = vpack.c.bf16 %v532_v34, %v531_v33  ;;  %v1348_v39 = vpack.c.bf16 %v518_v38, %v517_v37  ;;  %v533_v40 = vld [vmem:[%s1837_s3 + $0xc0] sm:$0xff]  ;;  %v534_v41 = vld [vmem:[%s1837_s3 + $0xc8] sm:$0xff]  ;;  %v519_v42 = vld [vmem:[%s1837_s3 + $0x50] sm:$0xff]  ;;  %s1409_s13 = sshll.u32 %s1472_s9, 4  ;;  %s1410_s13 = int_to_ptr.vmem [resolvable:$false] %s1409_s13 }
  0x17   : > { %s1362_s18 = smul.u32 24, %s1580_s17  ;;  %v1324_v43 = vpack.c.bf16 %v534_v41, %v533_v40  ;;  %v520_v44 = vld [vmem:[%s1837_s3 + $0x58] sm:$0xff]  ;;  %v535_v46 = vld [vmem:[%s1837_s3 + $0xd0] sm:$0xff]  ;;  %v521_v48 = vld [vmem:[%s1837_s3 + $0x60] sm:$0xff]  ;;  %s1411_s14 = scalar_lea.vmem %s1410_s13, 256 }
  0x18   : > { %v1351_v45 = vpack.c.bf16 %v520_v44, %v519_v42  ;;  %v536_v47 = vld [vmem:[%s1837_s3 + $0xd8] sm:$0xff]  ;;  %v522_v50 = vld [vmem:[%s1837_s3 + $0x68] sm:$0xff]  ;;  %v537_v52 = vld [vmem:[%s1837_s3 + $0xe0] sm:$0xff] }
  0x19   : > { %s282_s21 = scalar_lea.vmem %s1834_s0, %s1362_s18  ;;  %v1327_v49 = vpack.c.bf16 %v536_v47, %v535_v46  ;;  %v1354_v51 = vpack.c.bf16 %v522_v50, %v521_v48  ;;  %v538_v53 = vld [vmem:[%s1837_s3 + $0xe8] sm:$0xff]  ;;  %v523_v54 = vld [vmem:[%s1837_s3 + $0x70] sm:$0xff]  ;;  %v524_v56 = vld [vmem:[%s1837_s3 + $0x78] sm:$0xff]  ;;  %s272_s18 = scalar_lea.vmem [#allocation4], %s1106_s16 }
  0x1a   : > { %v1598_v4 = vld [vmem:[%s282_s21] sm:$0xff]  ;;  %v1600_v5 = vld [vmem:[%s282_s21 + $0x8] sm:$0xff]  ;;  %v1602_v6 = vld [vmem:[%s282_s21 + $0x10] sm:$0xff]  ;;  %v1330_v55 = vpack.c.bf16 %v538_v53, %v537_v52  ;;  %v1357_v57 = vpack.c.bf16 %v524_v56, %v523_v54  ;;  %s1021_s20 = sshll.u32 %s272_s18, 4  ;;  %s1022_s20 = int_to_ptr.vmem [resolvable:$true] %s1021_s20 }
  0x1b   : > { %296 = vst.msk [vmem:[#allocation2 + $0x1] sm:$0xff] %vm290_vm1, %v1598_v4  ;;  %297 = vst.msk [vmem:[#allocation2 + $0x9] sm:$0xff] %vm290_vm1, %v1600_v5  ;;  %v539_v58 = vld [vmem:[%s1837_s3 + $0xf0] sm:$0xff]  ;;  %v540_v59 = vld [vmem:[%s1837_s3 + $0xf8] sm:$0xff]  ;;  %s1405_s8 = scalar_lea.vmem %s1022_s20, 128  ;;  %p1412_p0 = scmp.lt.s32.totalorder %s1022_s20, %s1410_s13 }
  0x1c   : > { %298 = vst.msk [vmem:[#allocation2 + $0x11] sm:$0xff] %vm290_vm1, %v1602_v6  ;;  %v1333_v60 = vpack.c.bf16 %v540_v59, %v539_v58  ;;  %v1116_v63 = vld [vmem:[%s1836_s2] ss:$0 sm:$0xff]  ;;  %p1406_p11 = scmp.ne.s32.totalorder %s1022_s20, %s1405_s8  ;;  %p1413_p1 = scmp.lt.s32.totalorder %s1411_s14, %s1405_s8 }
  0x1e   : > { %p1407_p12 = pnand %p1406_p11, %p1551_p5  ;;  %p1414_p2 = por %p1413_p1, %p1412_p0 }
  0x20   : > { %p1408_p13 = pneg %p1407_p12 }
  0x22   : > { %v304_v16 = vld [vmem:[#allocation2 + $0x2] sm:$0xff]  ;;  %p1415_p3 = pnand %p1414_p2, %p1408_p13 }
  0x23   : > { %v301_v17 = vld [vmem:[#allocation2] sm:$0xff]  ;;  %1185 = vmatmul.mubr.msk.f32.vlgmr.msra.gmra.mrb[0].mxu0 %vm290_vm1, %v304_v16  ;;  %v305_v19 = vld [vmem:[#allocation2 + $0xa] sm:$0xff]  ;;  %v306_v27 = vld [vmem:[#allocation2 + $0x12] sm:$0xff] }
  0x24   : > { %1196 = vmatmul.mubr.msk.f32.vlgmr.msra.gmra.mrb[0].mxu1 %vm290_vm1, %v301_v17  ;;  %1187 = vmatprep.mubr.msk.f32.mxu0 %vm1470_vm3, %v1469_v1  ;;  %v302_v20 = vld [vmem:[#allocation2 + $0x8] sm:$0xff]  ;;  %v303_v28 = vld [vmem:[#allocation2 + $0x10] sm:$0xff] }
  0x25   : > { %1198 = vmatprep.mubr.msk.f32.mxu1 %vm1470_vm3, %v1469_v1  ;;  %1337 = vmatpush3.bf16.msra.mxu1 %v1336_v11 }
  0x26   : > { %1313 = vmatpush3.bf16.msra.mxu0 %v1312_v12  ;;  %1338 = vmatprep.subr.bf16.mxu1 %v1471_v3 }
  0x27   : > { %1314 = vmatprep.subr.bf16.mxu0 %v1471_v3  ;;  %1188 = vmatmul.mubr.msk.f32.gmra.mrb[2].mxu0 %vm290_vm1, %v305_v19 }
  0x28   : > { %1199 = vmatmul.mubr.msk.f32.gmra.mrb[2].mxu1 %vm290_vm1, %v302_v20  ;;  %1190 = vmatprep.mubr.msk.f32.mxu0 %vm1470_vm3, %v1469_v1 }
  0x29   : > { %1201 = vmatprep.mubr.msk.f32.mxu1 %vm1470_vm3, %v1469_v1  ;;  %1340 = vmatpush3.bf16.msra.mxu1 %v1339_v21  ;;  %v731_v21 = vld [vmem:[%s1838_s4] sm:$0xf] }
  0x2a   : > { %1316 = vmatpush3.bf16.msra.mxu0 %v1315_v22  ;;  %1341 = vmatprep.subr.bf16.mxu1 %v1471_v3 }
  0x2b   : > { %1317 = vmatprep.subr.bf16.mxu0 %v1471_v3  ;;  %1191 = vmatmul.mubr.msk.f32.gmra.mrb[4].mxu0 %vm290_vm1, %v306_v27  ;;  %v707_v27 = vlaneseq }
  0x2c   : > { %1202 = vmatmul.mubr.msk.f32.gmra.mrb[4].mxu1 %vm290_vm1, %v303_v28  ;;  %1236 = vmatprep.mubr.msk.f32.mxu0 %vm1470_vm3, %v1469_v1 }
  0x2d   : > { %1277 = vmatprep.mubr.msk.f32.mxu1 %vm1470_vm3, %v1469_v1  ;;  %1343 = vmatpush3.bf16.msra.mxu1 %v1342_v29  ;;  %v1769_v28 = vshrl.u32 %v707_v27, 7 }
  0x2e   : > { %1319 = vmatpush3.bf16.msra.mxu0 %v1318_v30  ;;  %1344 = vmatprep.subr.bf16.mxu1 %v1471_v3 }
  0x2f   : > { %1320 = vmatprep.subr.bf16.mxu0 %v1471_v3  ;;  %v709_v29 = vsub.s32 3, %v1769_v28  ;;  %v716_v32 = vsub.s32 0, %v1769_v28  ;;  %v723_v38 = vsub.s32 1, %v1769_v28  ;;  %v734_v47 = vsub.s32 2, %v1769_v28 }
  0x30   : > { %v835_v56 = vmul.u32 3, %v1769_v28 }
  0x31   : > { %1346 = vmatpush3.bf16.msra.mxu1 %v1345_v35 }
  0x32   : > { %1322 = vmatpush3.bf16.msra.mxu0 %v1321_v36  ;;  %1347 = vmatprep.subr.bf16.mxu1 %v1471_v3 }
  0x33   : > { %1323 = vmatprep.subr.bf16.mxu0 %v1471_v3 }
  0x35   : > { %1349 = vmatpush3.bf16.msra.mxu1 %v1348_v39 }
  0x36   : > { %1350 = vmatprep.subr.bf16.mxu1 %v1471_v3  ;;  %1325 = vmatpush3.bf16.msra.mxu0 %v1324_v43 }
  0x37   : > { %1326 = vmatprep.subr.bf16.mxu0 %v1471_v3 }
  0x39   : > { %1352 = vmatpush3.bf16.msra.mxu1 %v1351_v45 }
  0x3a   : > { %1353 = vmatprep.subr.bf16.mxu1 %v1471_v3  ;;  %1328 = vmatpush3.bf16.msra.mxu0 %v1327_v49 }
  0x3b   : > { %1329 = vmatprep.subr.bf16.mxu0 %v1471_v3 }
  0x3d   : > { %1355 = vmatpush3.bf16.msra.mxu1 %v1354_v51 }
  0x3e   : > { %1356 = vmatprep.subr.bf16.mxu1 %v1471_v3  ;;  %1331 = vmatpush3.bf16.msra.mxu0 %v1330_v55 }
  0x3f   : > { %1332 = vmatprep.subr.bf16.mxu0 %v1471_v3 }
  0x41   : > { %1358 = vmatpush3.bf16.msra.mxu1 %v1357_v57 }
  0x42   : > { %1359 = vmatprep.subr.bf16.mxu1 %v1471_v3  ;;  %1334 = vmatpush3.bf16.msra.mxu0 %v1333_v60 }
  0x43   : > { %1286 = vmatprep.subr.mxu0 %v1469_v1 }
  0xf6   : > { %v386_v61 = vpop.f32.mrb[0].mxu0 }
  0xf7   : > { %v478_v62 = vpop.f32.mrb[0].mxu1  ;;  %v1186_v2 = vpop.f32.mrb[1].mxu0 }
  0xf8   : > { %v479_v0 = vadd.f32 %v478_v62, %v386_v61  ;;  %v1197_v7 = vpop.f32.mrb[1].mxu1  ;;  %v837_v2 = vadd.s32 3, %v835_v56 }
  0xfa   : > { %v499_v8 = vadd.f32 %v1116_v63, %v479_v0  ;;  %v391_v9 = vpop.f32.mrb[2].mxu0  ;;  %v834_v0 = vand.u32 127, %v707_v27 }
  0xfb   : > { %v483_v10 = vpop.f32.mrb[2].mxu1  ;;  %v1189_v12 = vpop.f32.mrb[3].mxu0 }
  0xfc   : > { %506 = vst [vmem:[#allocation3 + $0x1] sm:$0xff] %v499_v8  ;;  %v484_v11 = vadd.f32 %v483_v10, %v391_v9  ;;  %v1200_v13 = vpop.f32.mrb[3].mxu1  ;;  %vm836_vm4 = vcmp.ge.s32.totalorder %v834_v0, %v835_v56  ;;  %vm838_vm5 = vcmp.lt.s32.totalorder %v834_v0, %v837_v2  ;;  %vm988_vm9 = vcmp.eq.s32.totalorder %v1769_v28, %v834_v0 }
  0xfd   : > { %vm839_vm6 = vmand %vm836_vm4, %vm838_vm5 }
  0xfe   : > { %v500_v3 = vadd.f32 %v1116_v63, %v484_v11  ;;  %v396_v14 = vpop.f32.mrb[4].mxu0 }
  0xff   : > { %v488_v15 = vpop.f32.mrb[4].mxu1  ;;  %v1192_v17 = vpop.f32.mrb[5].mxu0 }
 0x100   : > { %507 = vst [vmem:[#allocation3 + $0x9] sm:$0xff] %v500_v3  ;;  %v489_v16 = vadd.f32 %v488_v15, %v396_v14  ;;  %v1203_v18 = vpop.f32.mrb[5].mxu1 }
 0x101   : > { %v840_v18 = vsel %vm839_vm6, 0.33333334, %v1469_v1 }
 0x102   : > { %v501_v19 = vadd.f32 %v1116_v63, %v489_v16 }
 0x103   : > { %v541_v20 = vld [vmem:[#allocation3] sm:$0xff] }
 0x104   : > { %508 = vst [vmem:[#allocation3 + $0x11] sm:$0xff] %v501_v19  ;;  %1278 = vmatmul.mubr.f32.vlgmr.msra.gmra.mrb[6].mxu1 %v541_v20  ;;  %v917_v19 = vld [vmem:[%s1835_s1] sm:$0xff] }
 0x105   : > { %1280 = vmatprep.mubr.msk.f32.mxu1 %vm1470_vm3, %v1469_v1 }
 0x107   : > { %v544_v22 = vld [vmem:[#allocation3 + $0x2] sm:$0xff] }
 0x108   : > { %v542_v23 = vld [vmem:[#allocation3 + $0x8] sm:$0xff]  ;;  %1237 = vmatmul.mubr.f32.vlgmr.msra.gmra.mrb[6].mxu0 %v544_v22  ;;  %v989_v22 = vsel %vm988_vm9, 1.0, %v1469_v1 }
 0x109   : > { %1281 = vmatmul.mubr.f32.gmra.mrb[8].mxu1 %v542_v23  ;;  %1287 = vmatpush3.msk.msra.mxu0 %vm316_vm0, %v731_v21 }
 0x10a   : > { %1239 = vmatprep.mubr.msk.f32.mxu0 %vm1470_vm3, %v1469_v1  ;;  %1283 = vmatprep.mubr.msk.f32.mxu1 %vm1470_vm3, %v1469_v1 }
 0x10b   : > { %v545_v24 = vld [vmem:[#allocation3 + $0xa] sm:$0xff]  ;;  %v546_v26 = vld [vmem:[#allocation3 + $0x12] sm:$0xff] }
 0x10c   : > { %v543_v25 = vld [vmem:[#allocation3 + $0x10] sm:$0xff]  ;;  %1240 = vmatmul.mubr.f32.gmra.mrb[8].mxu0 %v545_v24 }
 0x10d   : > { %1284 = vmatmul.mubr.f32.gmra.mrb[10].mxu1 %v543_v25  ;;  %1242 = vmatprep.mubr.msk.f32.mxu0 %vm1470_vm3, %v1469_v1 }
 0x10e   : > { %1303 = vmatprep.mubr.msk.f32.mxu1 %vm1470_vm3, %v1469_v1 }
 0x110   : > { %1243 = vmatmul.mubr.f32.gmra.mrb[10].mxu0 %v546_v26 }
 0x111   : > { %1288 = vmatprep.mubr.msk.f32.mxu0 %vm1470_vm3, %v1469_v1 }
 0x114   : > { %1289 = vmatmul.mubr.msk.f32.vlgmr.msra.gmra.mrb[12].mxu0 %vm290_vm1, %v1598_v4  ;;  %v289_v4 = vld [vmem:[%s1839_s5] sm:$0xf] }
 0x115   : > { %1291 = vmatprep.mubr.msk.f32.mxu0 %vm1470_vm3, %v1469_v1  ;;  %v717_v36 = vrot.slane %v289_v4, %v716_v32  ;;  %v724_v46 = vrot.slane %v289_v4, %v723_v38  ;;  %v735_v54 = vrot.slane %v289_v4, %v734_v47 }
 0x118   : > { %1292 = vmatmul.mubr.msk.f32.gmra.mrb[14].mxu0 %vm290_vm1, %v1600_v5  ;;  %v710_v5 = vrot.slane %v289_v4, %v709_v29 }
 0x119   : > { %1294 = vmatprep.mubr.msk.f32.mxu0 %vm1470_vm3, %v1469_v1 }
 0x11c   : > { %1295 = vmatmul.mubr.msk.f32.gmra.mrb[16].mxu0 %vm290_vm1, %v1602_v6 }
 0x1d7   : > { %v693_v30 = vpop.f32.mrb[6].mxu1 }
 0x1d8   : > { %v1279_v31 = vpop.f32.mrb[7].mxu1 }
 0x1db   : > { %v613_v33 = vpop.f32.mrb[6].mxu0 }
 0x1dc   : > { %v698_v34 = vpop.f32.mrb[8].mxu1  ;;  %v694_v35 = vadd.f32 %v693_v30, %v613_v33  ;;  %v1238_v37 = vpop.f32.mrb[7].mxu0 }
 0x1dd   : > { %v1282_v6 = vpop.f32.mrb[9].mxu1 }
 0x1de   : > { %v711_v39 = vadd.f32 %v710_v5, %v694_v35 }
 0x1df   : > { %v618_v40 = vpop.f32.mrb[8].mxu0 }
 0x1e0   : > { %v703_v41 = vpop.f32.mrb[10].mxu1  ;;  %v718_v42 = vmul.f32 %v717_v36, %v711_v39  ;;  %v699_v43 = vadd.f32 %v698_v34, %v618_v40  ;;  %v1241_v44 = vpop.f32.mrb[9].mxu0 }
 0x1e1   : > { %v1285_v45 = vpop.f32.mrb[11].mxu1 }
 0x1e2   : > { %v712_v48 = vadd.f32 %v710_v5, %v699_v43  ;;  %v725_v53 = vadd.f32 %v724_v46, %v718_v42 }
 0x1e3   : > { %v623_v49 = vpop.f32.mrb[10].mxu0 }
 0x1e4   : > { %v719_v50 = vmul.f32 %v717_v36, %v712_v48  ;;  %v704_v51 = vadd.f32 %v703_v41, %v623_v49  ;;  %v1244_v52 = vpop.f32.mrb[11].mxu0  ;;  %v728_v59 = vmax.f32 %v725_v53, 0.0 }
 0x1e6   : > { %v713_v55 = vadd.f32 %v710_v5, %v704_v51  ;;  %v726_v62 = vadd.f32 %v724_v46, %v719_v50 }
 0x1e7   : > { %v814_v57 = vpop.f32.mrb[12].mxu0 }
 0x1e8   : > { %v720_v58 = vmul.f32 %v717_v36, %v713_v55  ;;  %v815_v60 = vadd.f32 %v814_v57, %v735_v54  ;;  %v1290_v61 = vpop.f32.mrb[13].mxu0  ;;  %v729_v8 = vmax.f32 %v726_v62, 0.0 }
 0x1ea   : > { %v828_v63 = vadd.f32 %v815_v60, %v728_v59  ;;  %v727_v11 = vadd.f32 %v724_v46, %v720_v58 }
 0x1eb   : > { %v819_v7 = vpop.f32.mrb[14].mxu0 }
 0x1ec   : > { %v820_v9 = vadd.f32 %v819_v7, %v735_v54  ;;  %v1293_v10 = vpop.f32.mrb[15].mxu0  ;;  %v730_v14 = vmax.f32 %v727_v11, 0.0 }
 0x1ee   : > { %v829_v12 = vadd.f32 %v820_v9, %v729_v8 }
 0x1ef   : > { %v824_v13 = vpop.f32.mrb[16].mxu0 }
 0x1f0   : > { %v1360_v3 = vpack.c.bf16 %v829_v12, %v828_v63  ;;  %v825_v15 = vadd.f32 %v824_v13, %v735_v54  ;;  %v1296_v16 = vpop.f32.mrb[17].mxu0 }
 0x1f2   : > { %v830_v17 = vadd.f32 %v825_v15, %v730_v14  ;;  %1361 = vmatpush3.bf16.msra.mxu1 %v1360_v3 }
 0x1f3   : > { %1301 = vmatprep.subr.mxu1 %v1469_v1 }
 0x1f6   : > { %1302 = vmatpush3.msra.mxu1 %v830_v17 }
 0x1f7   : > { %1304 = vmatmul.mubr.msk.f32.vlgmr.msra.gmra.mrb[12].mxu1 %vm841_vm7, %v840_v18  ;;  %1306 = vmatprep.subr.mxu1 %v1469_v1 }
 0x1f8   : > { %1308 = vmatprep.mubr.msk.f32.mxu1 %vm1470_vm3, %v1469_v1 }
 0x1fd   : > { %1307 = vmatpush3.xpose.msra.mxu1 %v917_v19 }
 0x200   : > { %1309 = vmatmul.mubr.f32.vlgmr.msra.gmra.mrb[14].mxu1 %v917_v19 }
 0x2ca   : > { %v911_v20 = vpop.f32.mrb[12].mxu1 }
 0x2cb   : > { %916 = vst.msk [vmem:[%s272_s18] sm:$0xff] %vm915_vm8, %v911_v20  ;;  %v1305_v21 = vpop.f32.mrb[13].mxu1 }
 0x2d3   : > { %v984_v23 = vpop.f32.mrb[14].mxu1 }
 0x2d4   : > { %v990_v24 = vsub.f32 %v984_v23, %v989_v22  ;;  %v1310_v25 = vpop.f32.mrb[15].mxu1 }
 0x2d6   : > { %v991_v26 = vmul.f32 %v990_v24, %v990_v24 }
 0x2d8   : > { %v993_v27 = vsel %vm992_vm10, %v991_v26, 0.0 }
 0x2d9   : > { %994 = vadd.xlane.f32.xlu0 %v993_v27 }
 0x2da   : > { %1418 = shalt.err (!%p1415_p3)
}
 0x2db   : > { %s1419_s28 = scalar_lea.hbm %s1794_s23, 128  ;;  %s1423_s18 = scalar_lea.hbm %s1840_s6, 256 }
 0x2dc   : > { %p1420_p4 = scmp.ne.s32.totalorder %s1794_s23, %s1419_s28  ;;  %p1424_p9 = scmp.lt.u32.totalorder %s1794_s23, %s1840_s6 }
 0x2dd   : > { %p1425_p10 = scmp.lt.u32.totalorder %s1423_s18, %s1419_s28  ;;  %p1427_p12 = scmp.lt.u32.totalorder %s1419_s28, %s1794_s23 }
 0x2de   : > { %p1421_p7 = pnand %p1420_p4, %p1551_p5 }
 0x2df   : > { %p1426_p11 = por %p1425_p10, %p1424_p9 }
 0x2e0   : > { %p1422_p8 = pneg %p1421_p7 }
 0x2e1   : > { %p1428_p13 = por %p1427_p12, %p1426_p11 }
 0x2e3   : > { %p1429_p0 = pnand %p1428_p13, %p1422_p8 }
 0x2e5   : > { %1432 = shalt.err (!%p1429_p0)
}
 0x2e6   : > { %1363 = dma.vmem_to_hbm [thread:$0]  (%p1551_p5), %s1022_s20, 128, %s1794_s23, %s1005_s29   ;;  %vm1002_vm11 = vcmask 0  }
 0x2e7   : > { %s285_s9 = scalar_lea.vmem %s1841_s7, %s1580_s17 }
 0x366   : > { %v995_v1 = vpop.xlane.xlu0 %994 }
 0x367   : > { %v996_v28 = vrot.slane %v995_v1, 4 }
 0x369   : > { %v997_v29 = vadd.f32 %v996_v28, %v995_v1 }
 0x36b   : > { %v998_v30 = vrot.slane %v997_v29, 2 }
 0x36d   : > { %v999_v4 = vadd.f32 %v998_v30, %v997_v29 }
 0x36f   : > { %v1000_v31 = vrot.slane %v999_v4, 1 }
 0x371   : > { %v1001_v32 = vadd.f32 %v1000_v31, %v999_v4 }
 0x373   : > { %1003 = vst.msk [vmem:[%s285_s9] sm:$0x1] %vm1002_vm11, %v1001_v32 }
 0x374 PF: > { %p1369_p1 = scmp.ge.s32.totalorder %s1467_s27, 2  ;;  %s1036_s11 = sand.u32 1, %s1455_s24  }
 0x375   : > { %s1037_s20 = scalar_lea.sflag [#allocation5], %s1036_s11 }
 0x376   : > { %p1366_p5 = pnand %p1369_p1, %p1555_p6 }
 0x378   : > { %1450 = dma.done.wait (!%p1366_p5), %s1037_s20, 128  }
 0x379   : > { %1452 = vsyncadd (!%p1366_p5), %s1037_s20, 4294967168  ;;  %p18_p2 = scmp.ge.s32.totalorder %s1538_s30, 4   ;;  %s1844_s24 = smov %s1459_s25 }
 0x37a   : > { %s1845_s25 = smov %s1463_s26  ;;  %s1846_s26 = smov %s1549_s10 }
 0x37b   : > { %s1847_s27 = smov %s1538_s30  ;;  %20 = sbr.rel (!%p18_p2) target bundleno = 3 (0x3), region = 91 }
 0x382   :  { %1048 = vsyncpa [#allocation5], 1 }
 0x383   :  { %1050 = vsyncpa [#allocation5 + $0x1], 1 }

</bundles_post_ra>
